<compile_context>
chip_gen: v7x
topology: tpu7x:2x2x1
jax: 0.10.0
libtpu: 0.0.40
codegen_flags: <defaults>
</compile_context>

<pallas_src>
import functools

import jax
import jax.numpy as jnp
from jax.experimental import pallas as pl
from jax.experimental.pallas import tpu as pltpu


def _lsr_ce_kernel(logits_ref, label_ref, loss_ref, *, lb_neg, lb_pos,
                   ignore_index, num_classes):
    """Label-smoothed CE for one (1, C, T) logits tile.

    logits_ref: (1, C, T) float     label_ref: (1, 1, T) int32
    loss_ref:   (1, 1, T) float32
    """
    x = logits_ref[...].astype(jnp.float32)              # (1, C, T)
    lbl = label_ref[...]                                  # (1, 1, T)

    # Stable log-softmax statistics over the class (sublane) axis.
    m = jnp.max(x, axis=1, keepdims=True)                 # (1, 1, T)
    lse = jnp.log(jnp.sum(jnp.exp(x - m), axis=1, keepdims=True))

    # sum_c logp_c = sum_c x_c - C * (m + lse)   (no logp materialization)
    sum_x = jnp.sum(x, axis=1, keepdims=True)
    sum_logp = sum_x - num_classes * (m + lse)

    # logp[target] = x[target] - m - lse
    cls_iota = jax.lax.broadcasted_iota(jnp.int32, x.shape, 1)
    x_t = jnp.sum(jnp.where(cls_iota == lbl, x, 0.0), axis=1, keepdims=True)
    logp_t = x_t - m - lse

    loss = -(lb_neg * sum_logp + (lb_pos - lb_neg) * logp_t)

    # Ignored positions contribute exactly 0 (the reference zeroes their
    # smoothed-label row before the multiply).
    valid = lbl != ignore_index
    loss_ref[...] = jnp.where(valid, loss, 0.0).astype(loss_ref.dtype)


def _choose_tile_hw(hw, c, itemsize):
    """Largest lane tile (multiple of 128) keeping the logits block ~512 KiB."""
    if hw <= 128:
        return hw                                  # full-dim block is legal
    target_elems = (512 * 1024) // max(1, c * itemsize)
    tile = min(hw, 8192, max(128, target_elems))
    return max(128, (tile // 128) * 128)


def label_smooth_softmax_ce_v2(logits, label, *, lb_smooth=0.1,
                               reduction="mean", ignore_index=-100,
                               tile_hw=None):
    """Forward pass of LabelSmoothSoftmaxCEV2.

    logits: (N, C, H, W) float ;  label: (N, H, W) int
    """
    N, C, H, W = logits.shape
    HW = H * W
    lb_pos = 1.0 - lb_smooth
    lb_neg = lb_smooth / C

    itemsize = jnp.dtype(logits.dtype).itemsize
    x = logits.reshape(N, C, HW)                   # free view, no HBM round-trip
    y = label.reshape(N, 1, HW).astype(jnp.int32)

    if tile_hw is None:
        tile_hw = _choose_tile_hw(HW, C, itemsize)

    grid = (N, pl.cdiv(HW, tile_hw))

    kernel = functools.partial(
        _lsr_ce_kernel,
        lb_neg=float(lb_neg),
        lb_pos=float(lb_pos),
        ignore_index=int(ignore_index),
        num_classes=float(C),
    )

    block_bytes = C * tile_hw * itemsize
    vmem_limit = int(min(64 << 20, max(16 << 20, 8 * block_bytes)))

    M = N * HW
    cost = pl.CostEstimate(
        flops=6 * M * C,
        transcendentals=M * C + M,
        bytes_accessed=M * C * itemsize + 8 * M,
    )

    loss_rows = pl.pallas_call(
        kernel,
        out_shape=jax.ShapeDtypeStruct((N, 1, HW), jnp.float32),
        grid_spec=pltpu.PrefetchScalarGridSpec(
            num_scalar_prefetch=0,
            grid=grid,
            in_specs=[
                pl.BlockSpec((1, C, tile_hw), lambda n, j: (n, 0, j)),
                pl.BlockSpec((1, 1, tile_hw), lambda n, j: (n, 0, j)),
            ],
            out_specs=pl.BlockSpec((1, 1, tile_hw), lambda n, j: (n, 0, j)),
        ),
        compiler_params=pltpu.CompilerParams(
            dimension_semantics=("parallel", "parallel"),
            vmem_limit_bytes=vmem_limit),
        cost_estimate=cost,
    )(x, y)

    loss = loss_rows.reshape(N, H, W)

    if reduction == "none":
        return loss.astype(logits.dtype)

    total = jnp.sum(loss)
    if reduction == "sum":
        return total.astype(logits.dtype)

    # reduction == 'mean': divide by number of non-ignored labels
    # (NaN/inf if every label is ignored, matching the PyTorch reference).
    n_valid = jnp.sum((label != ignore_index).astype(jnp.float32))
    return (total / n_valid).astype(logits.dtype)


def _reference(logits, label, *, lb_smooth=0.1, reduction="mean",
               ignore_index=-100):
    """Pure-JAX reference mirroring the PyTorch autograd.Function forward."""
    N, C, H, W = logits.shape
    lb_pos = 1.0 - lb_smooth
    lb_neg = lb_smooth / C
    ignore = label == ignore_index
    n_valid = jnp.sum(~ignore)
    safe_label = jnp.where(ignore, 0, label)
    onehot = jax.nn.one_hot(safe_label, C, axis=1)      # (N, C, H, W)
    smoothed = lb_neg + onehot * (lb_pos - lb_neg)
    smoothed = jnp.where(ignore[:, None, :, :], 0.0, smoothed)
    logp = jax.nn.log_softmax(logits, axis=1)
    loss = jnp.sum(-logp * smoothed, axis=1)            # (N, H, W)
    if reduction == "mean":
        return jnp.sum(loss) / n_valid
    if reduction == "sum":
        return jnp.sum(loss)
    return loss


if __name__ == "__main__":
    key = jax.random.PRNGKey(0)
    k1, k2, k3 = jax.random.split(key, 3)

    N, C, H, W = 2, 4, 16, 16
    logits = jax.random.normal(k1, (N, C, H, W), dtype=jnp.float32)
    label = jax.random.randint(k2, (N, H, W), 0, C, dtype=jnp.int32)
    # sprinkle in some ignore_index entries
    ignore_mask = jax.random.bernoulli(k3, 0.1, (N, H, W))
    label = jnp.where(ignore_mask, -100, label)

    out_mean = jax.block_until_ready(label_smooth_softmax_ce_v2(
        logits, label, lb_smooth=0.1, reduction="mean", ignore_index=-100))
    out_none = jax.block_until_ready(label_smooth_softmax_ce_v2(
        logits, label, lb_smooth=0.1, reduction="none", ignore_index=-100))

    ref_mean = _reference(logits, label, lb_smooth=0.1, reduction="mean",
                          ignore_index=-100)
    ref_none = _reference(logits, label, lb_smooth=0.1, reduction="none",
                          ignore_index=-100)

    assert jnp.allclose(out_mean, ref_mean, atol=1e-5, rtol=1e-5), (out_mean, ref_mean)
    assert jnp.allclose(out_none, ref_none, atol=1e-5, rtol=1e-5)

    print("KERNEL_OK")
</pallas_src>

<mosaic_0001>
module attributes {stable_mosaic.version = 11 : i64} {
  func.func @_lsr_ce_kernel(%arg0: i32, %arg1: i32, %arg2: memref<1x4x256xf32, #tpu.memory_space<vmem>>, %arg3: memref<1x1x256xi32, #tpu.memory_space<vmem>>, %arg4: memref<1x1x256xf32, #tpu.memory_space<vmem>>) attributes {dimension_semantics = [#tpu.dimension_semantics<parallel>, #tpu.dimension_semantics<parallel>], iteration_bounds = array<i64: 2, 1>, scalar_prefetch = 0 : i64, scratch_operands = 0 : i64, tpu.core_type = #tpu.core_type<tc>, window_params = [{transform_indices = @transform_0, window_bounds = array<i64: 1, 4, 256>}, {transform_indices = @transform_1, window_bounds = array<i64: 1, 1, 256>}, {transform_indices = @transform_2, window_bounds = array<i64: 1, 1, 256>}]} {
    %c0 = arith.constant 0 : index
    %c0_0 = arith.constant 0 : index
    %c0_1 = arith.constant 0 : index
    %0 = vector.load %arg2[%c0, %c0_0, %c0_1] : memref<1x4x256xf32, #tpu.memory_space<vmem>>, vector<1x4x256xf32>
    %c0_2 = arith.constant 0 : index
    %c0_3 = arith.constant 0 : index
    %c0_4 = arith.constant 0 : index
    %1 = vector.load %arg3[%c0_2, %c0_3, %c0_4] : memref<1x1x256xi32, #tpu.memory_space<vmem>>, vector<1x1x256xi32>
    %cst = arith.constant dense<0xFF800000> : vector<1x256xf32>
    %2 = vector.multi_reduction <maximumf>, %0, %cst [1] : vector<1x4x256xf32> to vector<1x256xf32>
    %3 = vector.shape_cast %2 : vector<1x256xf32> to vector<1x1x256xf32>
    %4 = vector.broadcast %3 : vector<1x1x256xf32> to vector<1x4x256xf32>
    %5 = arith.subf %0, %4 : vector<1x4x256xf32>
    %6 = math.exp %5 : vector<1x4x256xf32>
    %cst_5 = arith.constant dense<0.000000e+00> : vector<1x256xf32>
    %7 = vector.multi_reduction <add>, %6, %cst_5 [1] : vector<1x4x256xf32> to vector<1x256xf32>
    %8 = vector.shape_cast %7 : vector<1x256xf32> to vector<1x1x256xf32>
    %9 = math.log %8 : vector<1x1x256xf32>
    %cst_6 = arith.constant dense<0.000000e+00> : vector<1x256xf32>
    %10 = vector.multi_reduction <add>, %0, %cst_6 [1] : vector<1x4x256xf32> to vector<1x256xf32>
    %11 = vector.shape_cast %10 : vector<1x256xf32> to vector<1x1x256xf32>
    %12 = arith.addf %3, %9 : vector<1x1x256xf32>
    %cst_7 = arith.constant 4.000000e+00 : f32
    %13 = vector.broadcast %cst_7 : f32 to vector<1x1x256xf32>
    %14 = arith.mulf %13, %12 : vector<1x1x256xf32>
    %15 = arith.subf %11, %14 : vector<1x1x256xf32>
    %16 = tpu.iota {dimensions = array<i32: 1>} : vector<1x4x256xi32>
    %17 = vector.broadcast %1 : vector<1x1x256xi32> to vector<1x4x256xi32>
    %18 = arith.cmpi eq, %16, %17 : vector<1x4x256xi32>
    %cst_8 = arith.constant 0.000000e+00 : f32
    %19 = vector.broadcast %cst_8 : f32 to vector<1x4x256xf32>
    %20 = arith.select %18, %0, %19 : vector<1x4x256xi1>, vector<1x4x256xf32>
    %cst_9 = arith.constant dense<0.000000e+00> : vector<1x256xf32>
    %21 = vector.multi_reduction <add>, %20, %cst_9 [1] : vector<1x4x256xf32> to vector<1x256xf32>
    %22 = vector.shape_cast %21 : vector<1x256xf32> to vector<1x1x256xf32>
    %23 = arith.subf %22, %3 : vector<1x1x256xf32>
    %24 = arith.subf %23, %9 : vector<1x1x256xf32>
    %cst_10 = arith.constant 2.500000e-02 : f32
    %25 = vector.broadcast %cst_10 : f32 to vector<1x1x256xf32>
    %26 = arith.mulf %25, %15 : vector<1x1x256xf32>
    %cst_11 = arith.constant 8.750000e-01 : f32
    %27 = vector.broadcast %cst_11 : f32 to vector<1x1x256xf32>
    %28 = arith.mulf %27, %24 : vector<1x1x256xf32>
    %29 = arith.addf %26, %28 : vector<1x1x256xf32>
    %cst_12 = arith.constant 0.000000e+00 : f32
    %30 = vector.broadcast %cst_12 : f32 to vector<1x1x256xf32>
    %31 = arith.subf %30, %29 : vector<1x1x256xf32>
    %c-100_i32 = arith.constant -100 : i32
    %32 = vector.broadcast %c-100_i32 : i32 to vector<1x1x256xi32>
    %33 = arith.cmpi ne, %1, %32 : vector<1x1x256xi32>
    %cst_13 = arith.constant 0.000000e+00 : f32
    %34 = vector.broadcast %cst_13 : f32 to vector<1x1x256xf32>
    %35 = arith.select %33, %31, %34 : vector<1x1x256xi1>, vector<1x1x256xf32>
    %c0_14 = arith.constant 0 : index
    %c0_15 = arith.constant 0 : index
    %c0_16 = arith.constant 0 : index
    %36 = vector.load %arg4[%c0_14, %c0_15, %c0_16] : memref<1x1x256xf32, #tpu.memory_space<vmem>>, vector<1x1x256xf32>
    tpu.vector_store %arg4[%c0_14, %c0_15, %c0_16], %35 {strides = array<i32>} : memref<1x1x256xf32, #tpu.memory_space<vmem>>, vector<1x1x256xf32>,
    return
  }
  func.func @transform_0(%arg0: i32, %arg1: i32) -> (i32, i32, i32) {
    %c0_i32 = arith.constant 0 : i32
    %c0_i32_0 = arith.constant 0 : i32
    return %arg0, %c0_i32, %arg1 : i32, i32, i32
  }
  func.func @transform_1(%arg0: i32, %arg1: i32) -> (i32, i32, i32) {
    %c0_i32 = arith.constant 0 : i32
    %c0_i32_0 = arith.constant 0 : i32
    return %arg0, %c0_i32, %arg1 : i32, i32, i32
  }
  func.func @transform_2(%arg0: i32, %arg1: i32) -> (i32, i32, i32) {
    %c0_i32 = arith.constant 0 : i32
    %c0_i32_0 = arith.constant 0 : i32
    return %arg0, %c0_i32, %arg1 : i32, i32, i32
  }
}

</mosaic_0001>

<bundles_post_ra>
// kernel: tpu_custom_call.1
= control target key start
LH: loop header
LB: loop body
LE: loop exit
PB: predicated region body
PF: predicated region fallthrough
CT: control target
= control target key end

     0   :  { %7 = vsyncpa [#allocation3], 0  ;;  %s998_s0 = inlined_call_operand.hbm [shape: f32[2,4,256], index: 0, kind: input, shape index: {}]   ;;  %s999_s1 = inlined_call_operand.hbm [shape: s32[2,1,256], index: 1, kind: input, shape index: {}]   ;;  %s1000_s2 = inlined_call_operand.hbm [shape: f32[2,1,256], index: 2, kind: output, shape index: {}]  }
   0x1   :  { %9 = vsyncpa [#allocation3 + $0x1], 0 }
   0x2   :  { %10 = vsyncpa [#allocation6], 0 }
   0x3   :  { %12 = vsyncpa [#allocation6 + $0x1], 0 }
   0x4   :  { %13 = vsyncpa [#allocation4], 0 }
   0x5   :  { %15 = vsyncpa [#allocation4 + $0x1], 0  ;;  %s747_s9 = smov 0   ;;  %s749_s10 = smov 0  }
   0x6   :  { %s751_s11 = smov 0   ;;  %s753_s12 = smov 0  }
   0x7   :  { %s755_s13 = smov 0   ;;  %s757_s14 = smov 0  }
   0x8 LB: > { %s483_s15 = sadd.s32 4294967295, %s726_s14   ;;  %s484_s16 = sadd.s32 4294967294, %s726_s14   ;;  %s726_s14 = sphi %s757_s14, %s21_s14   ;;  %s722_s13 = sphi %s755_s13, %s1020_s13   ;;  %s718_s12 = sphi %s753_s12, %s1019_s12   ;;  %s714_s11 = sphi %s751_s11, %s1018_s11   ;;  %s710_s10 = sphi %s749_s10, %s1017_s10   ;;  %s706_s9 = sphi %s747_s9, %s1016_s9  }
   0x9   : > { %s33_s17 = sadd.s32 1, %s722_s13  ;;  %s42_s18 = sadd.s32 1, %s714_s11 }
   0xa   : > { %p35_p0 = scmp.ge.s32.totalorder %s33_s17, 2  ;;  %p49_p1 = scmp.ne.s32.totalorder %s714_s11, %s710_s10 }
   0xb   : > { %p50_p2 = scmp.eq.s32.totalorder %s726_s14, 0  ;;  %p55_p3 = scmp.ne.s32.totalorder %s710_s10, %s706_s9 }
   0xc   : > { %s1022_s17 = smov (%p35_p0, %s33_s17), 0  ;;  %p56_p5 = scmp.eq.s32.totalorder %s483_s15, 0 }
   0xd   : > { %p788_p4 = por %p50_p2, %p49_p1  ;;  %s37_s20 = ssub.s32 %s722_s13, %s1022_s17 }
   0xe   : > { %p109_p6 = scmp.eq.s32.totalorder %s483_s15, 1  ;;  %p40_p7 = scmp.eq.s32.totalorder %s37_s20, 0 }
   0xf   : > { %p794_p8 = por %p56_p5, %p55_p3  ;;  %p115_p10 = scmp.eq.s32.totalorder %s484_s16, 1 }
  0x10   : > { %p798_p9 = por %p109_p6, %p49_p1  ;;  %p522_p13 = scmp.lt.s32.totalorder %s726_s14, 2 }
  0x11   : > { %s1004_s21 = scalar_select %p794_p8, 1, 0 }
  0x12   : > { %s1005_s22 = scalar_select %p798_p9, 1, 0 }
  0x13   : > { %s803_s23 = scalar_select %p40_p7, %s714_s11, %s42_s18  }
  0x14   : > { %p805_p11 = por %p115_p10, %p55_p3  ;;  %s812_s25 = sand.u32 1, %s714_s11  }
  0x15   : > { %s487_s26 = sshll.u32 %s812_s25, 3  ;;  %s502_s27 = sshll.u32 %s722_s13, 7 }
  0x16   : > { %s1006_s24 = scalar_select %p805_p11, 1, 0 }
  0x17   : > { %s819_s30 = scalar_lea.hbm %s998_s0, %s502_s27  ;;  %s139_s3 = scalar_lea.vmem [#allocation2], %s487_s26 }
  0x18   : > { %s149_s4 = sshll.u32 %s139_s3, 4  ;;  %p825_p0 = pnand %p522_p13, %p788_p4  ;;  %s821_s4 = int_to_ptr.vmem [resolvable:$true] %s149_s4 }
  0x19   : > { %s136_s6 = scalar_lea.sflag [#allocation3], %s812_s25  ;;  %s580_s7 = scalar_lea.hbm %s819_s30, 128 }
  0x1a   : > { %p581_p3 = scmp.ne.s32.totalorder %s819_s30, %s580_s7  ;;  %p582_p5 = pneg %p825_p0 }
  0x1b   : > { %s585_s16 = scalar_lea.hbm %s998_s0, 256  ;;  %p586_p4 = scmp.lt.u32.totalorder %s819_s30, %s998_s0 }
  0x1c   : > { %p583_p6 = pnand %p582_p5, %p581_p3  ;;  %p587_p10 = scmp.lt.u32.totalorder %s585_s16, %s580_s7 }
  0x1d   : > { %p589_p12 = scmp.lt.u32.totalorder %s580_s7, %s819_s30 }
  0x1e   : > { %p584_p7 = pneg %p583_p6  ;;  %p588_p13 = por %p587_p10, %p586_p4 }
  0x20   : > { %p590_p1 = por %p589_p12, %p588_p13 }
  0x22   : > { %p591_p2 = pnand %p590_p1, %p584_p7 }
  0x24   : > { %594 = shalt.err (!%p591_p2)
}
  0x25   : > { %s595_s20 = scalar_lea.vmem %s821_s4, 128  ;;  %s728_s26 = smov [#allocation2]  }
  0x26   : > { %p596_p3 = scmp.ne.s32.totalorder %s821_s4, %s595_s20  ;;  %s600_s27 = sshll.u32 %s728_s26, 4  ;;  %s601_s27 = int_to_ptr.vmem [resolvable:$false] %s600_s27 }
  0x27   : > { %s602_s28 = scalar_lea.vmem %s601_s27, 256  ;;  %p603_p9 = scmp.lt.s32.totalorder %s821_s4, %s601_s27 }
  0x28   : > { %p598_p6 = pnand %p596_p3, %p582_p5  ;;  %p604_p4 = scmp.lt.s32.totalorder %s602_s28, %s595_s20 }
  0x2a   : > { %p599_p11 = pneg %p598_p6  ;;  %p605_p10 = por %p604_p4, %p603_p9 }
  0x2c   : > { %p606_p12 = pnand %p605_p10, %p599_p11 }
  0x2e   : > { %609 = shalt.err (!%p606_p12)
}
  0x2f   : > { %514 = dma.hbm_to_vmem [thread:$0]  (!%p825_p0), %s819_s30, 128, %s821_s4, %s136_s6  }
  0x30   : > { %p1008_p1 = scmp.lt.s32.totalorder %s726_s14, 3  ;;  %p1009_p2 = scmp.ge.s32.totalorder %s726_s14, 1 }
  0x31   : > { %s490_s3 = sshll.u32 %s812_s25, 1  ;;  %s503_s7 = sshll.u32 %s722_s13, 5 }
  0x32   : > { %p861_p7 = pnand %p1009_p2, %p1008_p1  ;;  %s870_s16 = scalar_lea.hbm %s999_s1, %s503_s7 }
  0x33   : > { %s160_s18 = scalar_lea.vmem [#allocation5], %s490_s3  ;;  %s157_s30 = scalar_lea.sflag [#allocation6], %s812_s25 }
  0x34   : > { %s1010_s29 = scalar_select %p861_p7, 1, 0 }
  0x35   : > { %s170_s19 = sshll.u32 %s160_s18, 4  ;;  %s610_s4 = scalar_lea.hbm %s870_s16, 32  ;;  %s171_s19 = int_to_ptr.vmem [resolvable:$true] %s170_s19 }
  0x36   : > { %p611_p9 = scmp.ne.s32.totalorder %s870_s16, %s610_s4  ;;  %s615_s26 = scalar_lea.hbm %s999_s1, 64 }
  0x37   : > { %p616_p3 = scmp.lt.u32.totalorder %s870_s16, %s999_s1  ;;  %p617_p6 = scmp.lt.u32.totalorder %s615_s26, %s610_s4 }
  0x38   : > { %p613_p11 = pnand %p611_p9, %p582_p5  ;;  %p619_p10 = scmp.lt.u32.totalorder %s610_s4, %s870_s16 }
  0x39   : > { %p618_p4 = por %p617_p6, %p616_p3 }
  0x3a   : > { %p614_p13 = pneg %p613_p11 }
  0x3b   : > { %p620_p12 = por %p619_p10, %p618_p4 }
  0x3d   : > { %p621_p1 = pnand %p620_p12, %p614_p13 }
  0x3f   : > { %624 = shalt.err (!%p621_p1)
}
  0x40   : > { %s625_s25 = scalar_lea.vmem %s171_s19, 32  ;;  %s729_s3 = smov [#allocation5]  }
  0x41   : > { %p626_p2 = scmp.ne.s32.totalorder %s171_s19, %s625_s25  ;;  %s630_s7 = sshll.u32 %s729_s3, 4  ;;  %s631_s7 = int_to_ptr.vmem [resolvable:$false] %s630_s7 }
  0x42   : > { %s632_s8 = scalar_lea.vmem %s631_s7, 64  ;;  %p633_p8 = scmp.lt.s32.totalorder %s171_s19, %s631_s7 }
  0x43   : > { %p628_p9 = pnand %p626_p2, %p582_p5  ;;  %p634_p7 = scmp.lt.s32.totalorder %s632_s8, %s625_s25 }
  0x45   : > { %p629_p11 = pneg %p628_p9  ;;  %p635_p3 = por %p634_p7, %p633_p8 }
  0x47   : > { %p636_p6 = pnand %p635_p3, %p629_p11 }
  0x49   : > { %639 = shalt.err (!%p636_p6)
}
  0x4a   : > { %517 = dma.hbm_to_vmem [thread:$0]  (!%p825_p0), %s870_s16, 32, %s171_s19, %s157_s30  }
  0x4b   : > { %p1011_p13 = scmp.ne.s32.totalorder %s1010_s29, 0 }
  0x4c   : > { %s895_s15 = sand.u32 (!%p1011_p13), 1, %s710_s10   ;;  %p1012_p5 = scmp.ne.s32.totalorder (!%p1011_p13), %s1004_s21, 0 }
  0x4d   : > { %179 = sbr.rel (%p1011_p13) target bundleno = 182 (0xb6), region = 28  ;;  %s494_s18 = sshll.u32 (!%p1011_p13), %s895_s15, 3 }
  0x4e   : > { %s182_s4 = scalar_lea.sflag (!%p1011_p13), [#allocation3], %s895_s15  ;;  %s185_s6 = scalar_lea.vmem (!%p1011_p13), [#allocation2], %s494_s18 }
  0x54   : > { %693 = dma.done.wait (%p1012_p5), %s182_s4, 128  }
  0x55   : > { %695 = vsyncadd (%p1012_p5), %s182_s4, 4294967168  ;;  %s495_s5 = sshll.u32 %s895_s15, 1  ;;  %s191_s29 = scalar_lea.sflag [#allocation6], %s895_s15 }
  0x56   : > { %s194_s16 = scalar_lea.vmem [#allocation5], %s495_s5 }
  0x57   : > { %697 = dma.done.wait (%p1012_p5), %s191_s29, 32  }
  0x58   : > { %699 = vsyncadd (%p1012_p5), %s191_s29, 4294967264  ;;  %vm228_vm0 = vcmask 1043456   ;;  %v223_v0 = vld [vmem:[%s185_s6] sm:$0xff]  ;;  %v291_v9 = vlaneseq  ;;  %v921_v19 = vld [vmem:[%s194_s16] sm:$0x3]  ;;  %s219_s21 = scalar_lea.vmem [#allocation7], %s495_s5 }
  0x59   : > { %v226_v1 = vcombine.high %v223_v0, %v223_v0  ;;  %v229_v2 = vsel %vm228_vm0, %v223_v0, -inf  ;;  %v271_v40 = vsel %vm228_vm0, %v223_v0, 0.0  ;;  %s373_s19 = sshll.u32 %s219_s21, 4  ;;  %s504_s30 = sshll.u32 %s718_s12, 5  ;;  %vm331_vm3 = vcmp.ne.s32.totalorder %v921_v19, 4294967196  ;;  %s946_s19 = int_to_ptr.vmem [resolvable:$true] %s373_s19 }
  0x5a   : > { %v230_v3 = vrot.slane %v229_v2, 4  ;;  %v914_v14 = vshrl.u32 %v291_v9, 7  ;;  %v272_v45 = vrot.slane %v271_v40, 4  ;;  %vm353_vm4 = vcmp.lt.s32.totalorder %v291_v9, 256  ;;  %s951_s27 = scalar_lea.hbm %s1000_s2, %s504_s30  ;;  %s357_s28 = scalar_lea.sflag [#allocation4], %s895_s15 }
  0x5b   : > { %v236_v4 = vsel %vm228_vm0, %v226_v1, -inf  ;;  %v278_v44 = vsel %vm228_vm0, %v226_v1, 0.0  ;;  %s640_s25 = scalar_lea.vmem %s946_s19, 32  ;;  %p1013_p0 = scmp.ne.s32.totalorder %s1005_s22, 0 }
  0x5c   : > { %v231_v5 = vmax.f32 %v229_v2, %v230_v3  ;;  %v237_v6 = vrot.slane %v236_v4, 4  ;;  %v295_v18 = vsub.s32 0, %v914_v14  ;;  %v299_v21 = vsub.s32 1, %v914_v14  ;;  %p641_p8 = scmp.ne.s32.totalorder %s946_s19, %s640_s25  ;;  %s731_s12 = smov [#allocation7]  }
  0x5d   : > { %v279_v49 = vrot.slane %v278_v44, 4  ;;  %v273_v53 = vadd.f32 %v272_v45, %v271_v40  ;;  %s644_s3 = sshll.u32 %s731_s12, 4  ;;  %s645_s3 = int_to_ptr.vmem [resolvable:$false] %s644_s3 }
  0x5e   : > { %v232_v7 = vrot.slane %v231_v5, 2  ;;  %v238_v8 = vmax.f32 %v236_v4, %v237_v6  ;;  %v296_v23 = vrot.slane %v921_v19, %v295_v18  ;;  %v300_v25 = vrot.slane %v921_v19, %v299_v21  ;;  %p642_p7 = pnand %p641_p8, %p1013_p0  ;;  %s646_s7 = scalar_lea.vmem %s645_s3, 64 }
  0x5f   : > { %v280_v57 = vadd.f32 %v279_v49, %v278_v44  ;;  %v274_v60 = vrot.slane %v273_v53, 2  ;;  %p647_p10 = scmp.lt.s32.totalorder %s946_s19, %s645_s3  ;;  %p648_p12 = scmp.lt.s32.totalorder %s646_s7, %s640_s25 }
  0x60   : > { %v233_v10 = vmax.f32 %v231_v5, %v232_v7  ;;  %v239_v11 = vrot.slane %v238_v8, 2  ;;  %vm301_vm1 = vcmp.eq.s32.totalorder %v914_v14, %v296_v23  ;;  %vm302_vm2 = vcmp.eq.s32.totalorder %v914_v14, %v300_v25  ;;  %p643_p4 = pneg %p642_p7 }
  0x61   : > { %v303_v26 = vsel %vm301_vm1, %v223_v0, 0.0  ;;  %v304_v27 = vsel %vm302_vm2, %v226_v1, 0.0  ;;  %v281_v62 = vrot.slane %v280_v57, 2  ;;  %p649_p1 = por %p648_p12, %p647_p10 }
  0x62   : > { %v234_v12 = vrot.slane %v233_v10, 1  ;;  %v240_v13 = vmax.f32 %v238_v8, %v239_v11  ;;  %v305_v28 = vsel %vm228_vm0, %v303_v26, 0.0  ;;  %v312_v29 = vsel %vm228_vm0, %v304_v27, 0.0 }
  0x63   : > { %v306_v30 = vrot.slane %v305_v28, 4  ;;  %v313_v34 = vrot.slane %v312_v29, 4  ;;  %v282_v2 = vadd.f32 %v281_v62, %v280_v57  ;;  %v730_v27 = vmov 1966171168   ;;  %p650_p2 = pnand %p649_p1, %p643_p4 }
  0x64   : > { %v916_v15 = vmax.f32 %v233_v10, %v234_v12  ;;  %v241_v16 = vrot.slane %v240_v13, 1 }
  0x65   : > { %v307_v37 = vadd.f32 %v306_v30, %v305_v28  ;;  %v314_v41 = vadd.f32 %v313_v34, %v312_v29  ;;  %v283_v8 = vrot.slane %v282_v2, 1  ;;  %v336_v28 = vunpack.c.l.s4 %v730_v27 }
  0x66   : > { %v918_v17 = vmax.f32 %v240_v13, %v241_v16 }
  0x67   : > { %v308_v46 = vrot.slane %v307_v37, 2  ;;  %v315_v50 = vrot.slane %v314_v41, 2  ;;  %v337_v34 = vunpack.c.0.s8 %v336_v28 }
  0x68   : > { %v245_v20 = vcombine.low %v916_v15, %v918_v17 }
  0x69   : > { %v309_v54 = vadd.f32 %v308_v46, %v307_v37  ;;  %v316_v58 = vadd.f32 %v315_v50, %v314_v41 }
  0x6a   : > { %v247_v22 = vsub.f32 %v223_v0, %v245_v20  ;;  %v275_v0 = vadd.f32 %v274_v60, %v273_v53  ;;  %v284_v20 = vadd.f32 %v283_v8, %v282_v2 }
  0x6b   : > { %v310_v61 = vrot.slane %v309_v54, 1  ;;  %v317_v63 = vrot.slane %v316_v58, 1 }
  0x6c   : > { %v248_v24 = vmul.f32 1.442695, %v247_v22  ;;  %v276_v4 = vrot.slane %v275_v0, 1 }
  0x6d   : > { %v311_v1 = vadd.f32 %v310_v61, %v309_v54  ;;  %v318_v3 = vadd.f32 %v317_v63, %v316_v58 }
  0x6e   : > { %574 = vpow2.f32 %v248_v24  ;;  %v277_v13 = vadd.f32 %v276_v4, %v275_v0 }
  0x6f   : > { %v319_v5 = vsub.f32 %v311_v1, %v916_v15  ;;  %v320_v10 = vsub.f32 %v318_v3, %v918_v17 }
  0x78   : > { %v575_v31 = vpop.eup %574 }
  0x79   : > { %v251_v32 = vcombine.high %v575_v31, %v575_v31  ;;  %v253_v33 = vsel %vm228_vm0, %v575_v31, 0.0 }
  0x7a   : > { %v254_v35 = vrot.slane %v253_v33, 4 }
  0x7b   : > { %v260_v36 = vsel %vm228_vm0, %v251_v32, 0.0 }
  0x7c   : > { %v255_v38 = vadd.f32 %v254_v35, %v253_v33  ;;  %v261_v39 = vrot.slane %v260_v36, 4 }
  0x7e   : > { %v256_v42 = vrot.slane %v255_v38, 2  ;;  %v262_v43 = vadd.f32 %v261_v39, %v260_v36 }
  0x80   : > { %v257_v47 = vadd.f32 %v256_v42, %v255_v38  ;;  %v263_v48 = vrot.slane %v262_v43, 2 }
  0x82   : > { %v258_v51 = vrot.slane %v257_v47, 1  ;;  %v264_v52 = vadd.f32 %v263_v48, %v262_v43 }
  0x84   : > { %v259_v55 = vadd.f32 %v258_v51, %v257_v47  ;;  %v265_v56 = vrot.slane %v264_v52, 1 }
  0x86   : > { %v266_v59 = vadd.f32 %v265_v56, %v264_v52  ;;  %576 = vlog2.f32 %v259_v55 }
  0x88   : > { %578 = vlog2.f32 %v266_v59 }
  0x90   : > { %v577_v6 = vpop.eup %576 }
  0x91   : > { %v268_v7 = vmul.f32 0.6931472, %v577_v6 }
  0x92   : > { %v579_v11 = vpop.eup %578 }
  0x93   : > { %v270_v12 = vmul.f32 0.6931472, %v579_v11  ;;  %v285_v16 = vadd.f32 %v268_v7, %v916_v15  ;;  %v321_v18 = vsub.f32 %v319_v5, %v268_v7 }
  0x95   : > { %v286_v21 = vadd.f32 %v270_v12, %v918_v17  ;;  %v287_v22 = vmul.f32 4.0, %v285_v16  ;;  %v322_v23 = vsub.f32 %v320_v10, %v270_v12  ;;  %v325_v26 = vmul.f32 0.875, %v321_v18 }
  0x96   : > { %v340_v17 = vsub.s32 %v337_v34, %v914_v14 }
  0x97   : > { %v288_v24 = vmul.f32 4.0, %v286_v21  ;;  %v289_v25 = vsub.f32 %v277_v13, %v287_v22  ;;  %v326_v31 = vmul.f32 0.875, %v322_v23 }
  0x99   : > { %v290_v29 = vsub.f32 %v284_v20, %v288_v24  ;;  %v323_v30 = vmul.f32 0.025, %v289_v25 }
  0x9b   : > { %v324_v32 = vmul.f32 0.025, %v290_v29  ;;  %v327_v33 = vadd.f32 %v325_v26, %v323_v30 }
  0x9d   : > { %v328_v15 = vadd.f32 %v326_v31, %v324_v32  ;;  %v329_v35 = vsub.f32 0.0, %v327_v33 }
  0x9f   : > { %v330_v36 = vsub.f32 0.0, %v328_v15 }
  0xa1   : > { %v334_v37 = vcombine.low %v329_v35, %v330_v36 }
  0xa3   : > { %v341_v38 = vrot.slane %v334_v37, %v340_v17 }
  0xa5   : > { %v348_v39 = vrot.slane %v341_v38, %v340_v17 }
  0xa7   : > { %v350_v14 = vsel %vm331_vm3, %v348_v39, 0.0 }
  0xa8   : > { %355 = vst.msk [vmem:[%s219_s21] sm:$0x3] %vm353_vm4, %v350_v14 }
  0xa9   : > { %653 = shalt.err (!%p650_p2)
}
  0xaa   : > { %s654_s8 = scalar_lea.hbm %s951_s27, 32  ;;  %s658_s4 = scalar_lea.hbm %s1000_s2, 64 }
  0xab   : > { %p655_p9 = scmp.ne.s32.totalorder %s951_s27, %s654_s8  ;;  %p659_p6 = scmp.lt.u32.totalorder %s951_s27, %s1000_s2 }
  0xac   : > { %p660_p13 = scmp.lt.u32.totalorder %s658_s4, %s654_s8  ;;  %p662_p8 = scmp.lt.u32.totalorder %s654_s8, %s951_s27 }
  0xad   : > { %p656_p11 = pnand %p655_p9, %p1013_p0 }
  0xae   : > { %p661_p5 = por %p660_p13, %p659_p6 }
  0xaf   : > { %p657_p3 = pneg %p656_p11 }
  0xb0   : > { %p663_p7 = por %p662_p8, %p661_p5 }
  0xb2   : > { %p664_p4 = pnand %p663_p7, %p657_p3 }
  0xb4   : > { %667 = shalt.err (!%p664_p4)
}
  0xb5   : > { %509 = dma.vmem_to_hbm [thread:$0]  (%p1013_p0), %s946_s19, 32, %s951_s27, %s357_s28  }
  0xb6 PF: > { %s385_s29 = sand.u32 1, %s706_s9   ;;  %p1014_p10 = scmp.ne.s32.totalorder %s1006_s24, 0 }
  0xb7   : > { %p1015_p12 = scmp.ge.s32.totalorder %s726_s14, 2  ;;  %s386_s16 = scalar_lea.sflag [#allocation4], %s385_s29 }
  0xb9   : > { %p519_p1 = pnand %p1015_p12, %p1014_p10 }
  0xbb   : > { %701 = dma.done.wait (!%p519_p1), %s386_s16, 32  }
  0xbc   : > { %703 = vsyncadd (!%p519_p1), %s386_s16, 4294967264  ;;  %s21_s14 = sadd.s32 1, %s726_s14   ;;  %s1016_s9 = smov %s710_s10 }
  0xbd   : > { %p18_p2 = scmp.ge.s32.totalorder %s21_s14, 4   ;;  %s1017_s10 = smov %s714_s11 }
  0xbe   : > { %s1018_s11 = smov %s803_s23  ;;  %s1019_s12 = smov %s722_s13 }
  0xbf   : > { %s1020_s13 = smov %s1022_s17  ;;  %20 = sbr.rel (!%p18_p2) target bundleno = 8 (0x8), region = 86 }
  0xc6   :  { %391 = vsyncpa [#allocation3], 1 }
  0xc7   :  { %393 = vsyncpa [#allocation3 + $0x1], 1 }
  0xc8   :  { %394 = vsyncpa [#allocation6], 1 }
  0xc9   :  { %396 = vsyncpa [#allocation6 + $0x1], 1 }
  0xca   :  { %397 = vsyncpa [#allocation4], 1 }
  0xcb   :  { %399 = vsyncpa [#allocation4 + $0x1], 1 }

</bundles_post_ra>
